<compile_context>
chip_gen: v7x
topology: tpu7x:2x2x1
jax: 0.10.0
libtpu: 0.0.40
codegen_flags: <defaults>
</compile_context>

<pallas_src>
import functools

import jax
import jax.numpy as jnp
from jax.experimental import pallas as pl
from jax.experimental.pallas import tpu as pltpu

LN_EPS = 1e-5


def _round_up(x, m):
    return (x + m - 1) // m * m


def _patch_embed_kernel(x_ref, g1_ref, b1_ref, w_ref, b_ref, g2_ref, b2_ref,
                        o_ref, *, d_real, h_real):
    """One (TM, Dp) token block -> (TM, Hp) embedding block.

    Dp / Hp are lane-padded (multiples of 128); padded input columns are zero.
    LayerNorm statistics use the real widths (d_real, h_real).
    """
    x = x_ref[...].astype(jnp.float32)          # (TM, Dp); padded cols are 0
    dp = x.shape[-1]
    hp = o_ref.shape[-1]

    # ---- LayerNorm over D (biased variance, matches torch.nn.LayerNorm) ----
    mu = jnp.sum(x, axis=-1, keepdims=True) * (1.0 / d_real)
    xc = x - mu
    if d_real != dp:                            # static: only if padded
        dmask = jax.lax.broadcasted_iota(jnp.int32, (1, dp), 1) < d_real
        xc = jnp.where(dmask, xc, 0.0)          # keep pad cols out of the stats
    var = jnp.sum(xc * xc, axis=-1, keepdims=True) * (1.0 / d_real)
    xn = xc * jax.lax.rsqrt(var + LN_EPS)
    xn = xn * g1_ref[...].astype(jnp.float32) + b1_ref[...].astype(jnp.float32)

    # ---- Linear D -> hidden on the MXU (bf16 operands, f32 accumulation) ----
    y = jnp.dot(xn.astype(jnp.bfloat16), w_ref[...],
                preferred_element_type=jnp.float32)
    y = y + b_ref[...].astype(jnp.float32)      # padded hidden cols stay 0

    # ---- Dropout: identity in eval mode ----
    # TODO(synk): training-mode dropout (pltpu.prng_* mask) not implemented.

    # ---- LayerNorm over hidden ----
    mu2 = jnp.sum(y, axis=-1, keepdims=True) * (1.0 / h_real)
    yc = y - mu2
    if h_real != hp:
        hmask = jax.lax.broadcasted_iota(jnp.int32, (1, hp), 1) < h_real
        yc = jnp.where(hmask, yc, 0.0)
    var2 = jnp.sum(yc * yc, axis=-1, keepdims=True) * (1.0 / h_real)
    yn = yc * jax.lax.rsqrt(var2 + LN_EPS)
    yn = yn * g2_ref[...].astype(jnp.float32) + b2_ref[...].astype(jnp.float32)

    o_ref[...] = yn.astype(o_ref.dtype)


def patch_embedding(x, params, *, patch_size, block_tokens=256):
    """x: (B, 3, H, W) float32. Returns (B, num_patches, hidden)."""
    B, C, H, W = x.shape
    assert C == 3
    assert H % patch_size == 0 and W % patch_size == 0
    hp_, wp_ = H // patch_size, W // patch_size
    D = patch_size * patch_size * C
    hidden = params["w"].shape[1]

    # rearrange 'b c (h p1) (w p2) -> b (h w) (p1 p2 c)'  (layout only)
    xr = x.reshape(B, C, hp_, patch_size, wp_, patch_size)
    xr = jnp.transpose(xr, (0, 2, 4, 3, 5, 1))          # b h w p1 p2 c
    tokens = xr.reshape(B * hp_ * wp_, D)               # (T, D)
    T = tokens.shape[0]

    # Lane-dense padded feature dims; token-row tile (multiple of 8 sublanes).
    Dp = _round_up(D, 128)
    Hp = _round_up(hidden, 128)
    tm = max(8, min(block_tokens, _round_up(T, 8)))
    tm = _round_up(tm, 8)
    Tp = _round_up(T, tm)

    tokens = jnp.pad(tokens, ((0, Tp - T), (0, Dp - D)))

    g1 = jnp.pad(params["g1"], (0, Dp - D)).reshape(1, Dp)
    b1 = jnp.pad(params["b1"], (0, Dp - D)).reshape(1, Dp)
    w = jnp.pad(params["w"], ((0, Dp - D), (0, Hp - hidden))).astype(jnp.bfloat16)
    b = jnp.pad(params["b"], (0, Hp - hidden)).reshape(1, Hp)
    g2 = jnp.pad(params["g2"], (0, Hp - hidden)).reshape(1, Hp)
    b2 = jnp.pad(params["b2"], (0, Hp - hidden)).reshape(1, Hp)

    grid = (Tp // tm,)

    # Rough VMEM budget: double-buffered token/out tiles (f32), resident bf16
    # weights + param rows, 3x headroom for in-kernel f32 temporaries.  Clamped
    # so it is safe on every generation (v7x physical VMEM = 64 MiB).
    vmem_need = (4 * (2 * tm * Dp + 2 * tm * Hp)
                 + 2 * Dp * Hp
                 + 4 * (2 * Dp + 3 * Hp))
    vmem_limit = int(min(max(3 * vmem_need, 16 << 20), 48 << 20))

    full = lambda shape: pl.BlockSpec(shape, lambda i: (0, 0))

    kernel = functools.partial(_patch_embed_kernel, d_real=D, h_real=hidden)

    out = pl.pallas_call(
        kernel,
        out_shape=jax.ShapeDtypeStruct((Tp, Hp), x.dtype),
        grid_spec=pltpu.PrefetchScalarGridSpec(
            num_scalar_prefetch=0,
            grid=grid,
            in_specs=[
                pl.BlockSpec((tm, Dp), lambda i: (i, 0)),
                full((1, Dp)), full((1, Dp)),
                full((Dp, Hp)), full((1, Hp)),
                full((1, Hp)), full((1, Hp)),
            ],
            out_specs=pl.BlockSpec((tm, Hp), lambda i: (i, 0)),
        ),
        compiler_params=pltpu.CompilerParams(
            dimension_semantics=("parallel",),
            vmem_limit_bytes=vmem_limit),
    )(tokens, g1, b1, w, b, g2, b2)

    return out[:T, :hidden].reshape(B, hp_ * wp_, hidden)


def init_params(key, patch_size, hidden_size):
    D = patch_size * patch_size * 3
    kw, kb = jax.random.split(key)
    bound = 1.0 / (D ** 0.5)
    # Matches nn.Linear default init; LayerNorm defaults are weight=1, bias=0.
    return {
        "g1": jnp.ones((D,), jnp.float32),
        "b1": jnp.zeros((D,), jnp.float32),
        "w": jax.random.uniform(kw, (D, hidden_size), jnp.float32,
                                -bound, bound),
        "b": jax.random.uniform(kb, (hidden_size,), jnp.float32,
                                -bound, bound),
        "g2": jnp.ones((hidden_size,), jnp.float32),
        "b2": jnp.zeros((hidden_size,), jnp.float32),
    }


def _reference(x, params, patch_size):
    B, C, H, W = x.shape
    hp_, wp_ = H // patch_size, W // patch_size
    D = patch_size * patch_size * C
    xr = x.reshape(B, C, hp_, patch_size, wp_, patch_size)
    xr = jnp.transpose(xr, (0, 2, 4, 3, 5, 1)).reshape(B, hp_ * wp_, D)

    def ln(v, g, b):
        mu = jnp.mean(v, -1, keepdims=True)
        var = jnp.mean((v - mu) ** 2, -1, keepdims=True)
        return (v - mu) * jax.lax.rsqrt(var + LN_EPS) * g + b

    h = ln(xr, params["g1"], params["b1"])
    h = h @ params["w"] + params["b"]
    h = ln(h, params["g2"], params["b2"])
    return h


if __name__ == "__main__":
    patch_size = 4
    hidden_size = 32
    B, C, H, W = 2, 3, 16, 16   # -> 16 patches/image, D = 48

    key = jax.random.PRNGKey(0)
    kx, kp = jax.random.split(key)
    x = jax.random.normal(kx, (B, C, H, W), jnp.float32)
    params = init_params(kp, patch_size, hidden_size)

    run = jax.jit(functools.partial(patch_embedding, patch_size=patch_size))
    out = jax.block_until_ready(run(x, params))

    ref = _reference(x, params, patch_size)
    assert out.shape == (B, (H // patch_size) * (W // patch_size), hidden_size)
    # bf16 MXU operands -> ~1e-2-level tolerance vs the pure-f32 reference.
    assert jnp.allclose(out, ref, atol=2e-2, rtol=2e-2), "mismatch vs reference"

    print("KERNEL_OK")
</pallas_src>

<mosaic_0001>
module attributes {stable_mosaic.version = 11 : i64} {
  func.func @_patch_embed_kernel(%arg0: i32, %arg1: memref<32x128xf32, #tpu.memory_space<vmem>>, %arg2: memref<1x128xf32, #tpu.memory_space<vmem>>, %arg3: memref<1x128xf32, #tpu.memory_space<vmem>>, %arg4: memref<128x128xbf16, #tpu.memory_space<vmem>>, %arg5: memref<1x128xf32, #tpu.memory_space<vmem>>, %arg6: memref<1x128xf32, #tpu.memory_space<vmem>>, %arg7: memref<1x128xf32, #tpu.memory_space<vmem>>, %arg8: memref<32x128xf32, #tpu.memory_space<vmem>>) attributes {dimension_semantics = [#tpu.dimension_semantics<parallel>], iteration_bounds = array<i64: 1>, scalar_prefetch = 0 : i64, scratch_operands = 0 : i64, tpu.core_type = #tpu.core_type<tc>, window_params = [{transform_indices = @transform_0, window_bounds = array<i64: 32, 128>}, {pipeline_mode = #tpu.pipeline_mode<synchronous>, transform_indices = @transform_1, window_bounds = array<i64: 1, 128>}, {pipeline_mode = #tpu.pipeline_mode<synchronous>, transform_indices = @transform_2, window_bounds = array<i64: 1, 128>}, {pipeline_mode = #tpu.pipeline_mode<synchronous>, transform_indices = @transform_3, window_bounds = array<i64: 128, 128>}, {pipeline_mode = #tpu.pipeline_mode<synchronous>, transform_indices = @transform_4, window_bounds = array<i64: 1, 128>}, {pipeline_mode = #tpu.pipeline_mode<synchronous>, transform_indices = @transform_5, window_bounds = array<i64: 1, 128>}, {pipeline_mode = #tpu.pipeline_mode<synchronous>, transform_indices = @transform_6, window_bounds = array<i64: 1, 128>}, {transform_indices = @transform_7, window_bounds = array<i64: 32, 128>}]} {
    %c0 = arith.constant 0 : index
    %c0_0 = arith.constant 0 : index
    %0 = vector.load %arg1[%c0, %c0_0] : memref<32x128xf32, #tpu.memory_space<vmem>>, vector<32x128xf32>
    %cst = arith.constant dense<0.000000e+00> : vector<32xf32>
    %1 = vector.multi_reduction <add>, %0, %cst [1] : vector<32x128xf32> to vector<32xf32>
    %2 = vector.shape_cast %1 : vector<32xf32> to vector<32x1xf32>
    %cst_1 = arith.constant 0.020833334 : f32
    %3 = vector.broadcast %cst_1 : f32 to vector<32x1xf32>
    %4 = arith.mulf %2, %3 : vector<32x1xf32>
    %5 = vector.broadcast %4 : vector<32x1xf32> to vector<32x128xf32>
    %6 = arith.subf %0, %5 : vector<32x128xf32>
    %7 = tpu.iota {dimensions = array<i32: 1>} : vector<1x128xi32>
    %c48_i32 = arith.constant 48 : i32
    %8 = vector.broadcast %c48_i32 : i32 to vector<1x128xi32>
    %9 = arith.cmpi slt, %7, %8 : vector<1x128xi32>
    %cst_2 = arith.constant 0.000000e+00 : f32
    %10 = vector.shape_cast %9 : vector<1x128xi1> to vector<1x128xi1>
    %11 = vector.broadcast %10 : vector<1x128xi1> to vector<32x128xi1>
    %12 = vector.broadcast %cst_2 : f32 to vector<32x128xf32>
    %13 = arith.select %11, %6, %12 : vector<32x128xi1>, vector<32x128xf32>
    %14 = arith.mulf %13, %13 : vector<32x128xf32>
    %cst_3 = arith.constant dense<0.000000e+00> : vector<32xf32>
    %15 = vector.multi_reduction <add>, %14, %cst_3 [1] : vector<32x128xf32> to vector<32xf32>
    %16 = vector.shape_cast %15 : vector<32xf32> to vector<32x1xf32>
    %cst_4 = arith.constant 0.020833334 : f32
    %17 = vector.broadcast %cst_4 : f32 to vector<32x1xf32>
    %18 = arith.mulf %16, %17 : vector<32x1xf32>
    %cst_5 = arith.constant 9.99999974E-6 : f32
    %19 = vector.broadcast %cst_5 : f32 to vector<32x1xf32>
    %20 = arith.addf %18, %19 : vector<32x1xf32>
    %21 = math.rsqrt %20 : vector<32x1xf32>
    %22 = vector.broadcast %21 : vector<32x1xf32> to vector<32x128xf32>
    %23 = arith.mulf %13, %22 : vector<32x128xf32>
    %c0_6 = arith.constant 0 : index
    %c0_7 = arith.constant 0 : index
    %24 = vector.load %arg2[%c0_6, %c0_7] : memref<1x128xf32, #tpu.memory_space<vmem>>, vector<1x128xf32>
    %25 = vector.broadcast %24 : vector<1x128xf32> to vector<32x128xf32>
    %26 = arith.mulf %23, %25 : vector<32x128xf32>
    %c0_8 = arith.constant 0 : index
    %c0_9 = arith.constant 0 : index
    %27 = vector.load %arg3[%c0_8, %c0_9] : memref<1x128xf32, #tpu.memory_space<vmem>>, vector<1x128xf32>
    %28 = vector.broadcast %27 : vector<1x128xf32> to vector<32x128xf32>
    %29 = arith.addf %26, %28 : vector<32x128xf32>
    %30 = arith.truncf %29 : vector<32x128xf32> to vector<32x128xbf16>
    %c0_10 = arith.constant 0 : index
    %c0_11 = arith.constant 0 : index
    %31 = vector.load %arg4[%c0_10, %c0_11] : memref<128x128xbf16, #tpu.memory_space<vmem>>, vector<128x128xbf16>
    %cst_12 = arith.constant dense<0.000000e+00> : vector<32x128xf32>
    %32 = tpu.matmul %30, %31, %cst_12 {dimension_numbers = #tpu.dot_dimension_numbers<[1], [0], [0], [1], [0, 0, 1, 1], [], []>} : vector<32x128xbf16>, vector<128x128xbf16>, vector<32x128xf32> -> vector<32x128xf32>
    %c0_13 = arith.constant 0 : index
    %c0_14 = arith.constant 0 : index
    %33 = vector.load %arg5[%c0_13, %c0_14] : memref<1x128xf32, #tpu.memory_space<vmem>>, vector<1x128xf32>
    %34 = vector.broadcast %33 : vector<1x128xf32> to vector<32x128xf32>
    %35 = arith.addf %32, %34 : vector<32x128xf32>
    %cst_15 = arith.constant dense<0.000000e+00> : vector<32xf32>
    %36 = vector.multi_reduction <add>, %35, %cst_15 [1] : vector<32x128xf32> to vector<32xf32>
    %37 = vector.shape_cast %36 : vector<32xf32> to vector<32x1xf32>
    %cst_16 = arith.constant 3.125000e-02 : f32
    %38 = vector.broadcast %cst_16 : f32 to vector<32x1xf32>
    %39 = arith.mulf %37, %38 : vector<32x1xf32>
    %40 = vector.broadcast %39 : vector<32x1xf32> to vector<32x128xf32>
    %41 = arith.subf %35, %40 : vector<32x128xf32>
    %42 = tpu.iota {dimensions = array<i32: 1>} : vector<1x128xi32>
    %c32_i32 = arith.constant 32 : i32
    %43 = vector.broadcast %c32_i32 : i32 to vector<1x128xi32>
    %44 = arith.cmpi slt, %42, %43 : vector<1x128xi32>
    %cst_17 = arith.constant 0.000000e+00 : f32
    %45 = vector.shape_cast %44 : vector<1x128xi1> to vector<1x128xi1>
    %46 = vector.broadcast %45 : vector<1x128xi1> to vector<32x128xi1>
    %47 = vector.broadcast %cst_17 : f32 to vector<32x128xf32>
    %48 = arith.select %46, %41, %47 : vector<32x128xi1>, vector<32x128xf32>
    %49 = arith.mulf %48, %48 : vector<32x128xf32>
    %cst_18 = arith.constant dense<0.000000e+00> : vector<32xf32>
    %50 = vector.multi_reduction <add>, %49, %cst_18 [1] : vector<32x128xf32> to vector<32xf32>
    %51 = vector.shape_cast %50 : vector<32xf32> to vector<32x1xf32>
    %cst_19 = arith.constant 3.125000e-02 : f32
    %52 = vector.broadcast %cst_19 : f32 to vector<32x1xf32>
    %53 = arith.mulf %51, %52 : vector<32x1xf32>
    %cst_20 = arith.constant 9.99999974E-6 : f32
    %54 = vector.broadcast %cst_20 : f32 to vector<32x1xf32>
    %55 = arith.addf %53, %54 : vector<32x1xf32>
    %56 = math.rsqrt %55 : vector<32x1xf32>
    %57 = vector.broadcast %56 : vector<32x1xf32> to vector<32x128xf32>
    %58 = arith.mulf %48, %57 : vector<32x128xf32>
    %c0_21 = arith.constant 0 : index
    %c0_22 = arith.constant 0 : index
    %59 = vector.load %arg6[%c0_21, %c0_22] : memref<1x128xf32, #tpu.memory_space<vmem>>, vector<1x128xf32>
    %60 = vector.broadcast %59 : vector<1x128xf32> to vector<32x128xf32>
    %61 = arith.mulf %58, %60 : vector<32x128xf32>
    %c0_23 = arith.constant 0 : index
    %c0_24 = arith.constant 0 : index
    %62 = vector.load %arg7[%c0_23, %c0_24] : memref<1x128xf32, #tpu.memory_space<vmem>>, vector<1x128xf32>
    %63 = vector.broadcast %62 : vector<1x128xf32> to vector<32x128xf32>
    %64 = arith.addf %61, %63 : vector<32x128xf32>
    %c0_25 = arith.constant 0 : index
    %c0_26 = arith.constant 0 : index
    %65 = vector.load %arg8[%c0_25, %c0_26] : memref<32x128xf32, #tpu.memory_space<vmem>>, vector<32x128xf32>
    tpu.vector_store %arg8[%c0_25, %c0_26], %64 {strides = array<i32>} : memref<32x128xf32, #tpu.memory_space<vmem>>, vector<32x128xf32>,
    return
  }
  func.func @transform_0(%arg0: i32) -> (i32, i32) {
    %c0_i32 = arith.constant 0 : i32
    %c0_i32_0 = arith.constant 0 : i32
    return %arg0, %c0_i32 : i32, i32
  }
  func.func @transform_1(%arg0: i32) -> (i32, i32) {
    %c0_i32 = arith.constant 0 : i32
    %c0_i32_0 = arith.constant 0 : i32
    %c0_i32_1 = arith.constant 0 : i32
    return %c0_i32, %c0_i32_0 : i32, i32
  }
  func.func @transform_2(%arg0: i32) -> (i32, i32) {
    %c0_i32 = arith.constant 0 : i32
    %c0_i32_0 = arith.constant 0 : i32
    %c0_i32_1 = arith.constant 0 : i32
    return %c0_i32, %c0_i32_0 : i32, i32
  }
  func.func @transform_3(%arg0: i32) -> (i32, i32) {
    %c0_i32 = arith.constant 0 : i32
    %c0_i32_0 = arith.constant 0 : i32
    %c0_i32_1 = arith.constant 0 : i32
    return %c0_i32, %c0_i32_0 : i32, i32
  }
  func.func @transform_4(%arg0: i32) -> (i32, i32) {
    %c0_i32 = arith.constant 0 : i32
    %c0_i32_0 = arith.constant 0 : i32
    %c0_i32_1 = arith.constant 0 : i32
    return %c0_i32, %c0_i32_0 : i32, i32
  }
  func.func @transform_5(%arg0: i32) -> (i32, i32) {
    %c0_i32 = arith.constant 0 : i32
    %c0_i32_0 = arith.constant 0 : i32
    %c0_i32_1 = arith.constant 0 : i32
    return %c0_i32, %c0_i32_0 : i32, i32
  }
  func.func @transform_6(%arg0: i32) -> (i32, i32) {
    %c0_i32 = arith.constant 0 : i32
    %c0_i32_0 = arith.constant 0 : i32
    %c0_i32_1 = arith.constant 0 : i32
    return %c0_i32, %c0_i32_0 : i32, i32
  }
  func.func @transform_7(%arg0: i32) -> (i32, i32) {
    %c0_i32 = arith.constant 0 : i32
    %c0_i32_0 = arith.constant 0 : i32
    return %arg0, %c0_i32 : i32, i32
  }
}

</mosaic_0001>

<bundles_post_ra>
// kernel: patch_embedding.1
= control target key start
LH: loop header
LB: loop body
LE: loop exit
PB: predicated region body
PF: predicated region fallthrough
CT: control target
= control target key end

     0   :  { %s534_s0 = inlined_call_operand.vmem [shape: f32[32,128], index: 0, kind: input, shape index: {}]   ;;  %s535_s1 = inlined_call_operand.vmem [shape: f32[1,128], index: 1, kind: input, shape index: {}]   ;;  %s536_s2 = inlined_call_operand.vmem [shape: f32[1,128], index: 2, kind: input, shape index: {}]   ;;  %s537_s3 = inlined_call_operand.vmem [shape: bf16[128,128], index: 3, kind: input, shape index: {}]   ;;  %s538_s4 = inlined_call_operand.vmem [shape: f32[1,128], index: 4, kind: input, shape index: {}]   ;;  %s539_s5 = inlined_call_operand.vmem [shape: f32[1,128], index: 5, kind: input, shape index: {}]   ;;  %s540_s6 = inlined_call_operand.vmem [shape: f32[1,128], index: 6, kind: input, shape index: {}]   ;;  %s541_s7 = inlined_call_operand.hbm [shape: f32[32,128], index: 7, kind: output, shape index: {}]  }
   0x1   :  { %v28_v0 = vld [vmem:[%s534_s0] sm:$0xff]  ;;  %v30_v1 = vld [vmem:[%s534_s0 + $0x10] sm:$0xff]  ;;  %v29_v2 = vld [vmem:[%s534_s0 + $0x8] sm:$0xff] }
   0x2   :  { %32 = vadd.xlane.f32.xlu0 %v28_v0  ;;  %36 = vadd.xlane.f32.xlu1 %v30_v1  ;;  %v31_v3 = vld [vmem:[%s534_s0 + $0x18] sm:$0xff] }
   0x6   :  { %34 = vadd.xlane.f32.xlu0 %v29_v2  ;;  %38 = vadd.xlane.f32.xlu1 %v31_v3 }
   0x7   :  { %12 = vsyncpa [#allocation3], 0  ;;  %v368_v4 = vld [vmem:[%s537_s3] sm:$0xff]   ;;  %v48_v5 = vlaneseq  ;;  %v369_v27 = vld [vmem:[%s537_s3 + $0x8] sm:$0xff]   ;;  %s416_s30 = smov [#allocation2]  }
   0x8   :  { %345 = vmatprep.subr.bf16.mxu0 %v368_v4  ;;  %v370_v28 = vld [vmem:[%s537_s3 + $0x10] sm:$0xff]   ;;  %v371_v29 = vld [vmem:[%s537_s3 + $0x18] sm:$0xff]   ;;  %v372_v30 = vld [vmem:[%s537_s3 + $0x20] sm:$0xff]   ;;  %s311_s8 = sshll.u32 %s416_s30, 4  ;;  %s312_s8 = int_to_ptr.vmem [resolvable:$true] %s311_s8 }
   0x9   :  { %346 = vmatpush3.bf16.msra.mxu0 %v368_v4  ;;  %v474_v6 = vand.u32 127, %v48_v5  ;;  %v373_v31 = vld [vmem:[%s537_s3 + $0x28] sm:$0xff]   ;;  %v374_v32 = vld [vmem:[%s537_s3 + $0x30] sm:$0xff]   ;;  %v375_v33 = vld [vmem:[%s537_s3 + $0x38] sm:$0xff]   ;;  %p397_p1 = scmp.lt.s32.totalorder %s312_s8, %s312_s8 }
   0xa   :  { %347 = vmatprep.subr.bf16.mxu0 %v369_v27  ;;  %v322_v48 = vld [vmem:[%s535_s1] ss:$0 sm:$0xff] }
   0xb   :  { %vm50_vm0 = vcmp.lt.s32.totalorder %v474_v6, 48  ;;  %v323_v53 = vld [vmem:[%s536_s2] ss:$0 sm:$0xff]  ;;  %vm245_vm1 = vcmp.lt.s32.totalorder %v474_v6, 32 }
   0xd   :  { %348 = vmatpush3.bf16.msra.mxu0 %v369_v27 }
   0xe   :  { %349 = vmatprep.subr.bf16.mxu0 %v370_v28 }
  0x11   :  { %350 = vmatpush3.bf16.msra.mxu0 %v370_v28 }
  0x12   :  { %351 = vmatprep.subr.bf16.mxu0 %v371_v29 }
  0x15   :  { %352 = vmatpush3.bf16.msra.mxu0 %v371_v29 }
  0x16   :  { %353 = vmatprep.subr.bf16.mxu0 %v372_v30 }
  0x19   :  { %354 = vmatpush3.bf16.msra.mxu0 %v372_v30 }
  0x1a   :  { %355 = vmatprep.subr.bf16.mxu0 %v373_v31 }
  0x1d   :  { %356 = vmatpush3.bf16.msra.mxu0 %v373_v31 }
  0x1e   :  { %357 = vmatprep.subr.bf16.mxu0 %v374_v32 }
  0x21   :  { %358 = vmatpush3.bf16.msra.mxu0 %v374_v32 }
  0x22   :  { %359 = vmatprep.subr.bf16.mxu0 %v375_v33 }
  0x25   :  { %360 = vmatpush3.bf16.msra.mxu0 %v375_v33 }
  0x8f   :  { %v33_v7 = vpop.xlane.xlu0 %32  ;;  %v37_v8 = vpop.xlane.xlu1 %36 }
  0x90   :  { %v40_v9 = vmul.f32 0.020833334, %v33_v7  ;;  %v42_v10 = vmul.f32 0.020833334, %v37_v8 }
  0x92   :  { %v44_v11 = vsub.f32 %v28_v0, %v40_v9  ;;  %v46_v12 = vsub.f32 %v30_v1, %v42_v10 }
  0x93   :  { %v35_v13 = vpop.xlane.xlu0 %34  ;;  %v39_v14 = vpop.xlane.xlu1 %38 }
  0x94   :  { %v41_v15 = vmul.f32 0.020833334, %v35_v13  ;;  %v43_v16 = vmul.f32 0.020833334, %v39_v14  ;;  %v53_v17 = vsel %vm50_vm0, %v44_v11, 0.0  ;;  %v55_v18 = vsel %vm50_vm0, %v46_v12, 0.0 }
  0x95   :  { %v57_v19 = vmul.f32 %v53_v17, %v53_v17  ;;  %v59_v22 = vmul.f32 %v55_v18, %v55_v18 }
  0x96   :  { %v45_v20 = vsub.f32 %v29_v2, %v41_v15  ;;  %v47_v21 = vsub.f32 %v31_v3, %v43_v16  ;;  %v324_v2 = vld [vmem:[%s538_s4] ss:$0 sm:$0xff] }
  0x97   :  { %61 = vadd.xlane.f32.xlu0 %v57_v19 }
  0x98   :  { %v54_v23 = vsel %vm50_vm0, %v45_v20, 0.0  ;;  %v56_v24 = vsel %vm50_vm0, %v47_v21, 0.0 }
  0x99   :  { %v58_v25 = vmul.f32 %v54_v23, %v54_v23  ;;  %v60_v26 = vmul.f32 %v56_v24, %v56_v24 }
  0x9b   :  { %65 = vadd.xlane.f32.xlu0 %v59_v22  ;;  %63 = vadd.xlane.f32.xlu1 %v58_v25 }
  0x9f   :  { %67 = vadd.xlane.f32.xlu1 %v60_v26 }
 0x124   :  { %v62_v34 = vpop.xlane.xlu0 %61 }
 0x125   :  { %v69_v35 = vmul.f32 0.020833334, %v62_v34 }
 0x127   :  { %v73_v36 = vadd.f32 1e-05, %v69_v35 }
 0x128   :  { %v64_v37 = vpop.xlane.xlu1 %63  ;;  %v66_v38 = vpop.xlane.xlu0 %65 }
 0x129   :  { %376 = vrsqrt.f32 %v73_v36  ;;  %v70_v39 = vmul.f32 0.020833334, %v64_v37  ;;  %v71_v40 = vmul.f32 0.020833334, %v66_v38 }
 0x12b   :  { %v74_v41 = vadd.f32 1e-05, %v70_v39  ;;  %v75_v42 = vadd.f32 1e-05, %v71_v40 }
 0x12c   :  { %v68_v43 = vpop.xlane.xlu1 %67 }
 0x12d   :  { %378 = vrsqrt.f32 %v74_v41  ;;  %v72_v44 = vmul.f32 0.020833334, %v68_v43 }
 0x12e   :  { %380 = vrsqrt.f32 %v75_v42 }
 0x12f   :  { %v76_v45 = vadd.f32 1e-05, %v72_v44  ;;  %v333_v44 = vld [vmem:[%s539_s5] ss:$0 sm:$0xff]  ;;  %s392_s5 = scalar_lea.vmem %s312_s8, 512 }
 0x130   :  { %p393_p0 = scmp.ne.s32.totalorder %s312_s8, %s392_s5  ;;  %p398_p2 = scmp.lt.s32.totalorder %s392_s5, %s392_s5 }
 0x131   :  { %382 = vrsqrt.f32 %v76_v45 }
 0x132   :  { %p399_p3 = por %p398_p2, %p397_p1 }
 0x133   :  { %v377_v46 = vpop.eup %376 }
 0x134   :  { %v81_v47 = vmul.f32 %v377_v46, %v53_v17  ;;  %p400_p4 = pnand %p399_p3, %p393_p0 }
 0x136   :  { %v92_v52 = vmul.f32 %v322_v48, %v81_v47  ;;  %v334_v47 = vld [vmem:[%s540_s6] ss:$0 sm:$0xff] }
 0x137   :  { %v379_v49 = vpop.eup %378 }
 0x138   :  { %v381_v50 = vpop.eup %380  ;;  %v82_v51 = vmul.f32 %v379_v49, %v54_v23  ;;  %v103_v57 = vadd.f32 %v323_v53, %v92_v52 }
 0x139   :  { %v83_v54 = vmul.f32 %v381_v50, %v55_v18 }
 0x13a   :  { %v93_v55 = vmul.f32 %v322_v48, %v82_v51 }
 0x13b   :  { %v383_v56 = vpop.eup %382  ;;  %v94_v60 = vmul.f32 %v322_v48, %v83_v54 }
 0x13c   :  { %v104_v58 = vadd.f32 %v323_v53, %v93_v55  ;;  %v84_v59 = vmul.f32 %v383_v56, %v56_v24 }
 0x13d   :  { %v105_v63 = vadd.f32 %v323_v53, %v94_v60 }
 0x13e   :  { %v107_v61 = vpack.c.bf16 %v104_v58, %v103_v57  ;;  %v95_v62 = vmul.f32 %v322_v48, %v84_v59 }
 0x140   :  { %361 = vmatprep.mubr.bf16.mxu0 %v107_v61  ;;  %v106_v0 = vadd.f32 %v323_v53, %v95_v62 }
 0x142   :  { %v108_v1 = vpack.c.bf16 %v106_v0, %v105_v63 }
 0x144   :  { %362 = vmatmul.mubr.bf16.vlgmr.msra.gmra.mrb[0].mxu0 %v108_v1 }
 0x217   :  { %v363_v3 = vpop.f32.mrb[0].mxu0 }
 0x218   :  { %v214_v4 = vpop.f32.mrb[1].mxu0  ;;  %v223_v10 = vadd.f32 %v363_v3, %v324_v2 }
 0x219   :  { %v215_v5 = vadd.f32 %v324_v2, %v214_v4  ;;  %v364_v7 = vpop.f32.mrb[2].mxu0 }
 0x21a   :  { %v217_v8 = vpop.f32.mrb[3].mxu0  ;;  %v226_v11 = vadd.f32 %v364_v7, %v324_v2 }
 0x21b   :  { %v218_v9 = vadd.f32 %v324_v2, %v217_v8  ;;  %229 = vadd.xlane.f32.xlu0 %v215_v5 }
 0x21d   :  { %231 = vadd.xlane.f32.xlu1 %v218_v9 }
 0x21f   :  { %233 = vadd.xlane.f32.xlu0 %v223_v10 }
 0x221   :  { %235 = vadd.xlane.f32.xlu1 %v226_v11 }
 0x2a8   :  { %v230_v12 = vpop.xlane.xlu0 %229 }
 0x2a9   :  { %v237_v13 = vmul.f32 0.03125, %v230_v12 }
 0x2aa   :  { %v232_v14 = vpop.xlane.xlu1 %231 }
 0x2ab   :  { %v241_v15 = vsub.f32 %v215_v5, %v237_v13  ;;  %v238_v16 = vmul.f32 0.03125, %v232_v14 }
 0x2ac   :  { %v234_v17 = vpop.xlane.xlu0 %233 }
 0x2ad   :  { %v242_v18 = vsub.f32 %v218_v9, %v238_v16  ;;  %v239_v19 = vmul.f32 0.03125, %v234_v17  ;;  %v248_v20 = vsel %vm245_vm1, %v241_v15, 0.0 }
 0x2ae   :  { %v236_v21 = vpop.xlane.xlu1 %235  ;;  %v252_v22 = vmul.f32 %v248_v20, %v248_v20 }
 0x2af   :  { %v243_v23 = vsub.f32 %v223_v10, %v239_v19  ;;  %v240_v24 = vmul.f32 0.03125, %v236_v21  ;;  %v249_v25 = vsel %vm245_vm1, %v242_v18, 0.0 }
 0x2b0   :  { %256 = vadd.xlane.f32.xlu0 %v252_v22  ;;  %v253_v26 = vmul.f32 %v249_v25, %v249_v25 }
 0x2b1   :  { %v244_v27 = vsub.f32 %v226_v11, %v240_v24  ;;  %v250_v28 = vsel %vm245_vm1, %v243_v23, 0.0 }
 0x2b2   :  { %258 = vadd.xlane.f32.xlu1 %v253_v26  ;;  %v254_v29 = vmul.f32 %v250_v28, %v250_v28 }
 0x2b3   :  { %v251_v30 = vsel %vm245_vm1, %v244_v27, 0.0 }
 0x2b4   :  { %260 = vadd.xlane.f32.xlu0 %v254_v29  ;;  %v255_v31 = vmul.f32 %v251_v30, %v251_v30 }
 0x2b6   :  { %262 = vadd.xlane.f32.xlu1 %v255_v31 }
 0x33d   :  { %v257_v32 = vpop.xlane.xlu0 %256 }
 0x33e   :  { %v264_v33 = vmul.f32 0.03125, %v257_v32 }
 0x33f   :  { %v259_v34 = vpop.xlane.xlu1 %258 }
 0x340   :  { %v268_v35 = vadd.f32 1e-05, %v264_v33  ;;  %v265_v36 = vmul.f32 0.03125, %v259_v34 }
 0x341   :  { %v261_v37 = vpop.xlane.xlu0 %260 }
 0x342   :  { %384 = vrsqrt.f32 %v268_v35  ;;  %v269_v38 = vadd.f32 1e-05, %v265_v36  ;;  %v266_v39 = vmul.f32 0.03125, %v261_v37 }
 0x343   :  { %v263_v40 = vpop.xlane.xlu1 %262 }
 0x344   :  { %386 = vrsqrt.f32 %v269_v38  ;;  %v270_v41 = vadd.f32 1e-05, %v266_v39  ;;  %v267_v42 = vmul.f32 0.03125, %v263_v40 }
 0x346   :  { %388 = vrsqrt.f32 %v270_v41  ;;  %v271_v43 = vadd.f32 1e-05, %v267_v42 }
 0x348   :  { %390 = vrsqrt.f32 %v271_v43 }
 0x34c   :  { %v385_v6 = vpop.eup %384 }
 0x34d   :  { %v276_v45 = vmul.f32 %v385_v6, %v248_v20 }
 0x34e   :  { %v387_v46 = vpop.eup %386 }
 0x34f   :  { %v287_v48 = vmul.f32 %v333_v44, %v276_v45  ;;  %v277_v49 = vmul.f32 %v387_v46, %v249_v25 }
 0x350   :  { %v389_v50 = vpop.eup %388 }
 0x351   :  { %v288_v51 = vmul.f32 %v333_v44, %v277_v49  ;;  %v278_v52 = vmul.f32 %v389_v50, %v250_v28  ;;  %v298_v53 = vadd.f32 %v334_v47, %v287_v48 }
 0x352   :  { %v391_v54 = vpop.eup %390 }
 0x353   :  { %v289_v55 = vmul.f32 %v333_v44, %v278_v52  ;;  %v279_v56 = vmul.f32 %v391_v54, %v251_v30  ;;  %v299_v57 = vadd.f32 %v334_v47, %v288_v51  ;;  %302 = vst [vmem:[#allocation2] sm:$0xff] %v298_v53 }
 0x355   :  { %v300_v58 = vadd.f32 %v334_v47, %v289_v55  ;;  %v290_v59 = vmul.f32 %v333_v44, %v279_v56  ;;  %303 = vst [vmem:[#allocation2 + $0x8] sm:$0xff] %v299_v57 }
 0x357   :  { %304 = vst [vmem:[#allocation2 + $0x10] sm:$0xff] %v300_v58  ;;  %v301_v60 = vadd.f32 %v334_v47, %v290_v59 }
 0x359   :  { %305 = vst [vmem:[#allocation2 + $0x18] sm:$0xff] %v301_v60 }
 0x35a   :  { %403 = shalt.err (!%p400_p4)
}
 0x35b   :  { %s404_s10 = scalar_lea.hbm %s541_s7, 512 }
 0x35c   :  { %p405_p5 = scmp.ne.s32.totalorder %s541_s7, %s404_s10  ;;  %p408_p6 = scmp.lt.u32.totalorder %s404_s10, %s541_s7 }
 0x35e   :  { %p410_p7 = pnand %p408_p6, %p405_p5 }
 0x360   :  { %413 = shalt.err (!%p410_p7)
}
 0x361   :  { %s417_s14 = smov 128   ;;  %s418_s15 = smov 8  }
 0x362   :  { %317 = dma.vmem_to_hbm [thread:$0]  %s312_s8, 512, %s541_s7, [#allocation3], %s417_s14, %s417_s14, %s418_s15  }
 0x363   :  { %414 = dma.done.wait [#allocation3], 512  }
 0x364   :  { %415 = vsyncadd [#allocation3], 4294966784 }
 0x365   :  { %321 = vsyncpa [#allocation3], 1 }

</bundles_post_ra>
